<compile_context>
chip_gen: v5e
topology: v5e:2x2
jax: 0.10.0
libtpu: 0.0.40
codegen_flags: <defaults>
</compile_context>

<pallas_src>
import functools

import jax
import jax.numpy as jnp
from jax.experimental import pallas as pl
from jax.experimental.pallas import tpu as pltpu


def _round_up(x: int, m: int) -> int:
    return ((x + m - 1) // m) * m


# ----------------------------- Pallas kernel --------------------------------
def conv_matmul_relu_kernel(p_ref, w_ref, b_ref, o_ref):
    # p_ref : (tm, Kdim) bf16   im2col patches tile (full contraction dim)
    # w_ref : (Kdim, tn) bf16   weight tile (VMEM-resident across M)
    # b_ref : (1, tn)    f32    bias tile
    # o_ref : (tm, tn)   bf16   output tile
    acc = jnp.dot(p_ref[...], w_ref[...], preferred_element_type=jnp.float32)
    acc = acc + b_ref[...]                      # bias broadcast over rows
    o_ref[...] = jnp.maximum(acc, 0.0).astype(o_ref.dtype)   # ReLU


def conv_matmul_relu(patches, w2d, bias2d, *, tm, tn):
    """(M, Kdim) bf16 @ (Kdim, Np) bf16 + bias -> ReLU -> (M, Np) bf16."""
    M, Kdim = patches.shape
    _, Np = w2d.shape
    grid = (pl.cdiv(M, tm), pl.cdiv(Np, tn))    # j innermost; patches (i,0)
                                                # stays put across the j loop.

    # VMEM accounting: double-buffered bf16 inputs + bf16 output; the (1, tn)
    # bias buffer is sublane-padded to (8, tn).  Generous headroom, capped at
    # 48 MiB so the budget is safe on v7x (64 MiB physical VMEM) as well as
    # v5e/v6e (128 MiB).
    tile_bytes = (2 * tm * Kdim * 2      # patches (bf16, 2 buffers)
                  + 2 * Kdim * tn * 2    # weight  (bf16, 2 buffers)
                  + 2 * 8 * tn * 4       # bias    (f32, sublane-padded)
                  + 2 * tm * tn * 2)     # output  (bf16, 2 buffers)
    vmem_limit = int(min(48 * 1024 * 1024,
                         max(4 * tile_bytes + 4 * 1024 * 1024,
                             16 * 1024 * 1024)))

    cost = pl.CostEstimate(
        flops=2 * M * Kdim * Np,
        transcendentals=0,
        bytes_accessed=M * Kdim * 2 + Kdim * Np * 2 + Np * 4 + M * Np * 2)

    return pl.pallas_call(
        conv_matmul_relu_kernel,
        out_shape=jax.ShapeDtypeStruct((M, Np), jnp.bfloat16),
        grid=grid,
        in_specs=[
            pl.BlockSpec((tm, Kdim), lambda i, j: (i, 0)),   # patches stream
            pl.BlockSpec((Kdim, tn), lambda i, j: (0, j)),   # weight (M-invariant)
            pl.BlockSpec((1, tn), lambda i, j: (0, j)),      # bias   (M-invariant)
        ],
        out_specs=pl.BlockSpec((tm, tn), lambda i, j: (i, j)),
        compiler_params=pltpu.CompilerParams(
            dimension_semantics=("parallel", "parallel"),
            vmem_limit_bytes=vmem_limit),
        cost_estimate=cost,
    )(patches, w2d, bias2d)


# ------------------------------ JAX glue -------------------------------------
def conv2d_block_forward(x_nchw, weight, bias, *, stride, padding):
    """Conv2dBlock forward: ZeroPad2d(padding) -> Conv2d(stride, bias) -> ReLU.

    x_nchw : (N, C_in, H, W) float32
    weight : (C_out, C_in, K, K) float32  (PyTorch conv weight layout)
    bias   : (C_out,) float32
    returns: (N, C_out, H_out, W_out) float32
    """
    N, Cin, H, W = x_nchw.shape
    Cout, _, K, _ = weight.shape
    Kdim = Cin * K * K

    # Patch extraction fused by XLA.  NHWC output, feature dim ordered
    # (c, kh, kw) -- same flatten order as weight.reshape(Cout, Cin*K*K).
    x_bf16 = x_nchw.astype(jnp.bfloat16)
    patches = jax.lax.conv_general_dilated_patches(
        x_bf16, (K, K), (stride, stride),
        padding=[(padding, padding), (padding, padding)],
        dimension_numbers=("NCHW", "OIHW", "NHWC"),
    )                                          # (N, Ho, Wo, Cin*K*K)
    _, Ho, Wo, _ = patches.shape
    M = N * Ho * Wo
    patches = patches.reshape(M, Kdim)         # free row-major reshape; no pad

    # Lane-dense output columns (unmasked stores); padding sliced off below.
    Np = _round_up(Cout, 128)
    if Np <= 512:
        tn = Np                 # single N tile -> patches read exactly once
    elif Np % 512 == 0:
        tn = 512
    elif Np % 256 == 0:
        tn = 256
    else:
        tn = 128

    # tm: big enough to amortize per-step overhead, small enough that mid-size
    # problems still produce >=2 parallel grid steps (v7x megacore).  The last
    # M block may be partial (masked store; garbage rows never read back).
    if M >= 1024:
        tm = 512
    elif M >= 512:
        tm = 256
    elif M >= 128:
        tm = 128
    else:
        tm = M                  # single block == full dim satisfies (8,128) rule

    w2d = weight.reshape(Cout, Kdim).T.astype(jnp.bfloat16)   # (Kdim, Cout)
    w2d = jnp.pad(w2d, ((0, 0), (0, Np - Cout)))               # tiny N-only pad
    b2d = jnp.pad(bias.astype(jnp.float32), (0, Np - Cout)).reshape(1, Np)

    out2d = conv_matmul_relu(patches, w2d, b2d, tm=tm, tn=tn)  # (M, Np) bf16

    out = out2d[:, :Cout].astype(jnp.float32).reshape(N, Ho, Wo, Cout)
    # PyTorch NCHW at the public boundary (module semantics); skip if the
    # consumer accepts NHWC.
    return out.transpose(0, 3, 1, 2)


# ------------------------------ main -----------------------------------------
if __name__ == "__main__":
    # Module hyper-params (small, consistent with Conv2dBlock defaults)
    N, Cin, H, W = 2, 4, 16, 16
    Cout, K, stride, padding = 8, 3, 1, 1

    key = jax.random.PRNGKey(0)
    kx, kw, kb = jax.random.split(key, 3)

    x = jax.random.normal(kx, (N, Cin, H, W), dtype=jnp.float32)
    weight = jax.random.normal(kw, (Cout, Cin, K, K), dtype=jnp.float32) * 0.1
    bias = jax.random.normal(kb, (Cout,), dtype=jnp.float32) * 0.1

    fwd = jax.jit(functools.partial(conv2d_block_forward,
                                    stride=stride, padding=padding))
    out = jax.block_until_ready(fwd(x, weight, bias))

    # Reference: XLA conv on the same bf16-rounded inputs (kernel multiplies
    # bf16 values on the MXU with f32 accumulation, stores bf16).
    xr = x.astype(jnp.bfloat16).astype(jnp.float32)
    wr = weight.astype(jnp.bfloat16).astype(jnp.float32)
    ref = jax.lax.conv_general_dilated(
        xr, wr, window_strides=(stride, stride),
        padding=[(padding, padding), (padding, padding)],
        dimension_numbers=("NCHW", "OIHW", "NCHW"))
    ref = jnp.maximum(ref + bias.reshape(1, Cout, 1, 1), 0.0)

    assert out.shape == (N, Cout, H, W), out.shape
    assert jnp.allclose(out, ref, atol=2e-2, rtol=2e-2), \
        float(jnp.max(jnp.abs(out - ref)))

    print("KERNEL_OK")
</pallas_src>

<mosaic_0001>
module attributes {stable_mosaic.version = 11 : i64} {
  func.func @conv_matmul_relu_kernel(%arg0: i32, %arg1: i32, %arg2: memref<256x36xbf16, #tpu.memory_space<vmem>>, %arg3: memref<36x128xbf16, #tpu.memory_space<vmem>>, %arg4: memref<1x128xf32, #tpu.memory_space<vmem>>, %arg5: memref<256x128xbf16, #tpu.memory_space<vmem>>) attributes {dimension_semantics = [#tpu.dimension_semantics<parallel>, #tpu.dimension_semantics<parallel>], iteration_bounds = array<i64: 2, 1>, scalar_prefetch = 0 : i64, scratch_operands = 0 : i64, tpu.core_type = #tpu.core_type<tc>, window_params = [{transform_indices = @transform_0, window_bounds = array<i64: 256, 36>}, {transform_indices = @transform_1, window_bounds = array<i64: 36, 128>}, {transform_indices = @transform_2, window_bounds = array<i64: 1, 128>}, {transform_indices = @transform_3, window_bounds = array<i64: 256, 128>}]} {
    %c0 = arith.constant 0 : index
    %c0_0 = arith.constant 0 : index
    %0 = vector.load %arg2[%c0, %c0_0] : memref<256x36xbf16, #tpu.memory_space<vmem>>, vector<256x36xbf16>
    %c0_1 = arith.constant 0 : index
    %c0_2 = arith.constant 0 : index
    %1 = vector.load %arg3[%c0_1, %c0_2] : memref<36x128xbf16, #tpu.memory_space<vmem>>, vector<36x128xbf16>
    %cst = arith.constant dense<0.000000e+00> : vector<256x128xf32>
    %2 = tpu.matmul %0, %1, %cst {dimension_numbers = #tpu.dot_dimension_numbers<[1], [0], [0], [1], [0, 0, 1, 1], [], []>} : vector<256x36xbf16>, vector<36x128xbf16>, vector<256x128xf32> -> vector<256x128xf32>
    %c0_3 = arith.constant 0 : index
    %c0_4 = arith.constant 0 : index
    %3 = vector.load %arg4[%c0_3, %c0_4] : memref<1x128xf32, #tpu.memory_space<vmem>>, vector<1x128xf32>
    %4 = vector.broadcast %3 : vector<1x128xf32> to vector<256x128xf32>
    %5 = arith.addf %2, %4 : vector<256x128xf32>
    %cst_5 = arith.constant 0.000000e+00 : f32
    %6 = vector.broadcast %cst_5 : f32 to vector<256x128xf32>
    %7 = arith.maximumf %5, %6 : vector<256x128xf32>
    %8 = arith.truncf %7 : vector<256x128xf32> to vector<256x128xbf16>
    %c0_6 = arith.constant 0 : index
    %c0_7 = arith.constant 0 : index
    %9 = vector.load %arg5[%c0_6, %c0_7] : memref<256x128xbf16, #tpu.memory_space<vmem>>, vector<256x128xbf16>
    tpu.vector_store %arg5[%c0_6, %c0_7], %8 {strides = array<i32>} : memref<256x128xbf16, #tpu.memory_space<vmem>>, vector<256x128xbf16>,
    return
  }
  func.func @transform_0(%arg0: i32, %arg1: i32) -> (i32, i32) {
    %c0_i32 = arith.constant 0 : i32
    %c0_i32_0 = arith.constant 0 : i32
    return %arg0, %c0_i32 : i32, i32
  }
  func.func @transform_1(%arg0: i32, %arg1: i32) -> (i32, i32) {
    %c0_i32 = arith.constant 0 : i32
    %c0_i32_0 = arith.constant 0 : i32
    return %c0_i32, %arg1 : i32, i32
  }
  func.func @transform_2(%arg0: i32, %arg1: i32) -> (i32, i32) {
    %c0_i32 = arith.constant 0 : i32
    %c0_i32_0 = arith.constant 0 : i32
    return %c0_i32, %arg1 : i32, i32
  }
  func.func @transform_3(%arg0: i32, %arg1: i32) -> (i32, i32) {
    %c0_i32 = arith.constant 0 : i32
    return %arg0, %arg1 : i32, i32
  }
}

</mosaic_0001>

<bundles_post_ra>
// kernel: conv2d_block_forward.1
= control target key start
LH: loop header
LB: loop body
LE: loop exit
PB: predicated region body
PF: predicated region fallthrough
CT: control target
= control target key end

     0   :  { %s994_s12 = smov 0   ;;  %s996_s13 = smov 0   ;;  %s1132_s0 = inlined_call_operand.vmem [shape: bf16[512,36], index: 0, kind: input, shape index: {}]   ;;  %s1133_s1 = inlined_call_operand.vmem [shape: bf16[36,128], index: 1, kind: input, shape index: {}]   ;;  %s1134_s2 = inlined_call_operand.vmem [shape: f32[1,128], index: 2, kind: input, shape index: {}]   ;;  %s1135_s3 = inlined_call_operand.vmem [shape: bf16[512,128], index: 3, kind: output, shape index: {}]  }
   0x1   :  { %s998_s14 = smov 0  }
   0x2 LB: > { %s25_s15 = sadd.s32 1, %s968_s13  ;;  %p708_p0 = scmp.ge.s32.totalorder %s972_s14, 1  ;;  %s972_s14 = sphi %s998_s14, %s13_s14   ;;  %s968_s13 = sphi %s996_s13, %s1137_s13   ;;  %s964_s12 = sphi %s994_s12, %s1136_s12  }
   0x3   : > { %p27_p1 = scmp.ge.s32.totalorder %s25_s15, 2  ;;  %p169_p2 = scmp.lt.s32.totalorder %s972_s14, 3 }
   0x5   : > { %s1139_s15 = smov (%p27_p1, %s25_s15), 0  ;;  %p170_p3 = pnand %p708_p0, %p169_p2 }
   0x6   : > { %s709_s18 = sshll.u32 (!%p170_p3), %s964_s12, 5 }
   0x7   : > { %173 = sbr.rel (%p170_p3) target bundleno = 226 (0xe2), region = 32  ;;  %p204_p4 = scmp.lt.s32.totalorder (!%p170_p3), %s709_s18, 63 }
   0xc   : > { %v262_v0 = vld [vmem:[%s1133_s1 + $0x10] sm:$0x3]  ;;  %vm411_vm0 = vcmask 1041408   ;;  %s1141_s18 = smov (!%p204_p4, %s709_s18), 63  ;;  %v820_v4 = vld [vmem:[%s1133_s1 + $0x8] sm:$0xff]  ;;  %v819_v5 = vld [vmem:[%s1133_s1] sm:$0xff] }
   0xd   : > { %v356_v1 = vunpack.c.l.b16 %v262_v0  ;;  %s710_s21 = sshll.u32 %s1141_s18, 2  ;;  %vm362_vm1 = vcmask 293888   ;;  %v1066_v24 = vld [vmem:[%s1134_s2] ss:$0 sm:$0xff] }
   0xe   : > { %s1029_s26 = scalar_lea.vmem %s1132_s0, %s710_s21  ;;  %s1077_s4 = scalar_lea.vmem %s1135_s3, %s710_s21 }
   0xf   : > { %v359_v2 = vpack.c.b16 %v356_v1, %v356_v1  ;;  %v803_v6 = vld [vmem:[%s1029_s26] sm:$0xff]  ;;  %v804_v10 = vld [vmem:[%s1029_s26 + $0x8] sm:$0xff]  ;;  %v805_v14 = vld [vmem:[%s1029_s26 + $0x10] sm:$0xff] }
  0x10   : > { %v807_v7 = vld [vmem:[%s1029_s26 + $0x20] sm:$0xff]  ;;  %v808_v11 = vld [vmem:[%s1029_s26 + $0x28] sm:$0xff]  ;;  %v809_v15 = vld [vmem:[%s1029_s26 + $0x30] sm:$0xff] }
  0x11   : > { %v413_v3 = vsel %vm411_vm0, %v359_v2, 0  ;;  %v811_v8 = vld [vmem:[%s1029_s26 + $0x40] sm:$0xff]  ;;  %v812_v12 = vld [vmem:[%s1029_s26 + $0x48] sm:$0xff]  ;;  %v813_v16 = vld [vmem:[%s1029_s26 + $0x50] sm:$0xff] }
  0x12   : > { %420 = vmatpush.bf16.msra.mxu0 %v413_v3  ;;  %916 = vmatpush.bf16.msra.mxu1 %v413_v3  ;;  %v815_v9 = vld [vmem:[%s1029_s26 + $0x60] sm:$0xff]  ;;  %v816_v13 = vld [vmem:[%s1029_s26 + $0x68] sm:$0xff]  ;;  %v817_v17 = vld [vmem:[%s1029_s26 + $0x70] sm:$0xff] }
  0x13   : > { %917 = vmatpush.bf16.msra.mxu2 %v413_v3  ;;  %918 = vmatpush.bf16.msra.mxu3 %v413_v3  ;;  %v806_v18 = vld [vmem:[%s1029_s26 + $0x18] sm:$0xff] }
  0x14   : > { %v810_v19 = vld [vmem:[%s1029_s26 + $0x38] sm:$0xff] }
  0x15   : > { %v814_v20 = vld [vmem:[%s1029_s26 + $0x58] sm:$0xff] }
  0x16   : > { %421 = vmatpush.bf16.msra.mxu0 %v820_v4  ;;  %919 = vmatpush.bf16.msra.mxu1 %v820_v4  ;;  %v818_v21 = vld [vmem:[%s1029_s26 + $0x78] sm:$0xff] }
  0x17   : > { %920 = vmatpush.bf16.msra.mxu2 %v820_v4  ;;  %921 = vmatpush.bf16.msra.mxu3 %v820_v4 }
  0x1a   : > { %422 = vmatpush.bf16.msra.mxu0 %v819_v5  ;;  %922 = vmatpush.bf16.msra.mxu1 %v819_v5 }
  0x1b   : > { %923 = vmatpush.bf16.msra.mxu2 %v819_v5  ;;  %924 = vmatpush.bf16.msra.mxu3 %v819_v5 }
  0x1d   : > { %785 = vmatmul.msk.bf16.vlgmr.msra.gmra.mxu0 %vm362_vm1, %v803_v6  ;;  %789 = vmatmul.msk.bf16.vlgmr.msra.gmra.mxu1 %vm362_vm1, %v807_v7 }
  0x1e   : > { %793 = vmatmul.msk.bf16.vlgmr.msra.gmra.mxu2 %vm362_vm1, %v811_v8  ;;  %797 = vmatmul.msk.bf16.vlgmr.msra.gmra.mxu3 %vm362_vm1, %v815_v9 }
  0x2d   : > { %786 = vmatmul.msk.bf16.gmra.mxu0 %vm362_vm1, %v804_v10  ;;  %790 = vmatmul.msk.bf16.gmra.mxu1 %vm362_vm1, %v808_v11 }
  0x2e   : > { %794 = vmatmul.msk.bf16.gmra.mxu2 %vm362_vm1, %v812_v12  ;;  %798 = vmatmul.msk.bf16.gmra.mxu3 %vm362_vm1, %v816_v13 }
  0x3d   : > { %787 = vmatmul.msk.bf16.gmra.mxu0 %vm362_vm1, %v805_v14  ;;  %791 = vmatmul.msk.bf16.gmra.mxu1 %vm362_vm1, %v809_v15 }
  0x3e   : > { %795 = vmatmul.msk.bf16.gmra.mxu2 %vm362_vm1, %v813_v16  ;;  %799 = vmatmul.msk.bf16.gmra.mxu3 %vm362_vm1, %v817_v17 }
  0x4d   : > { %788 = vmatmul.msk.bf16.gmra.mxu0 %vm362_vm1, %v806_v18  ;;  %792 = vmatmul.msk.bf16.gmra.mxu1 %vm362_vm1, %v810_v19 }
  0x4e   : > { %796 = vmatmul.msk.bf16.gmra.mxu2 %vm362_vm1, %v814_v20  ;;  %800 = vmatmul.msk.bf16.gmra.mxu3 %vm362_vm1, %v818_v21 }
  0x9a   : > { %v424_v22 = vpop.f32.mrf.mxu0  ;;  %v444_v23 = vpop.f32.mrf.mxu1 }
  0x9b   : > { %v425_v25 = vadd.f32 %v1066_v24, %v424_v22  ;;  %v445_v26 = vadd.f32 %v1066_v24, %v444_v23 }
  0x9d   : > { %v504_v33 = vmax.f32 %v425_v25, 0.0  ;;  %v512_v34 = vmax.f32 %v445_v26, 0.0 }
  0xa1   : > { %v464_v27 = vpop.f32.mrf.mxu2  ;;  %v484_v28 = vpop.f32.mrf.mxu3 }
  0xa2   : > { %v426_v29 = vpop.f32.mrf.mxu0  ;;  %v446_v30 = vpop.f32.mrf.mxu1  ;;  %v465_v39 = vadd.f32 %v1066_v24, %v464_v27  ;;  %v485_v40 = vadd.f32 %v1066_v24, %v484_v28 }
  0xa3   : > { %v427_v31 = vadd.f32 %v1066_v24, %v426_v29  ;;  %v447_v32 = vadd.f32 %v1066_v24, %v446_v30 }
  0xa4   : > { %v520_v47 = vmax.f32 %v465_v39, 0.0  ;;  %v528_v48 = vmax.f32 %v485_v40, 0.0 }
  0xa5   : > { %v505_v35 = vmax.f32 %v427_v31, 0.0  ;;  %v513_v36 = vmax.f32 %v447_v32, 0.0 }
  0xa7   : > { %v824_v37 = vpack.c.bf16 %v505_v35, %v504_v33  ;;  %v844_v38 = vpack.c.bf16 %v513_v36, %v512_v34 }
  0xa9   : > { %825 = vst [vmem:[%s1077_s4] sm:$0xff] %v824_v37   ;;  %v466_v41 = vpop.f32.mrf.mxu2  ;;  %v486_v42 = vpop.f32.mrf.mxu3 }
  0xaa   : > { %904 = vst [vmem:[%s1077_s4 + $0x20] sm:$0xff] %v844_v38   ;;  %v467_v43 = vadd.f32 %v1066_v24, %v466_v41  ;;  %v487_v44 = vadd.f32 %v1066_v24, %v486_v42  ;;  %v429_v45 = vpop.f32.mrf.mxu0  ;;  %v449_v46 = vpop.f32.mrf.mxu1 }
  0xab   : > { %v430_v53 = vadd.f32 %v1066_v24, %v429_v45  ;;  %v450_v54 = vadd.f32 %v1066_v24, %v449_v46 }
  0xac   : > { %v521_v49 = vmax.f32 %v467_v43, 0.0  ;;  %v529_v50 = vmax.f32 %v487_v44, 0.0 }
  0xad   : > { %v506_v61 = vmax.f32 %v430_v53, 0.0  ;;  %v514_v62 = vmax.f32 %v450_v54, 0.0 }
  0xae   : > { %v864_v51 = vpack.c.bf16 %v521_v49, %v520_v47  ;;  %v884_v52 = vpack.c.bf16 %v529_v50, %v528_v48 }
  0xb0   : > { %908 = vst [vmem:[%s1077_s4 + $0x40] sm:$0xff] %v864_v51  }
  0xb1   : > { %912 = vst [vmem:[%s1077_s4 + $0x60] sm:$0xff] %v884_v52   ;;  %v469_v55 = vpop.f32.mrf.mxu2  ;;  %v489_v56 = vpop.f32.mrf.mxu3 }
  0xb2   : > { %v431_v57 = vpop.f32.mrf.mxu0  ;;  %v451_v58 = vpop.f32.mrf.mxu1  ;;  %v470_v3 = vadd.f32 %v1066_v24, %v469_v55  ;;  %v490_v4 = vadd.f32 %v1066_v24, %v489_v56 }
  0xb3   : > { %v432_v59 = vadd.f32 %v1066_v24, %v431_v57  ;;  %v452_v60 = vadd.f32 %v1066_v24, %v451_v58 }
  0xb4   : > { %v522_v11 = vmax.f32 %v470_v3, 0.0  ;;  %v530_v12 = vmax.f32 %v490_v4, 0.0 }
  0xb5   : > { %v507_v63 = vmax.f32 %v432_v59, 0.0  ;;  %v515_v0 = vmax.f32 %v452_v60, 0.0 }
  0xb7   : > { %v829_v1 = vpack.c.bf16 %v507_v63, %v506_v61  ;;  %v849_v2 = vpack.c.bf16 %v515_v0, %v514_v62 }
  0xb9   : > { %901 = vst [vmem:[%s1077_s4 + $0x8] sm:$0xff] %v829_v1   ;;  %v471_v5 = vpop.f32.mrf.mxu2  ;;  %v491_v6 = vpop.f32.mrf.mxu3 }
  0xba   : > { %905 = vst [vmem:[%s1077_s4 + $0x28] sm:$0xff] %v849_v2   ;;  %v472_v7 = vadd.f32 %v1066_v24, %v471_v5  ;;  %v492_v8 = vadd.f32 %v1066_v24, %v491_v6  ;;  %v434_v9 = vpop.f32.mrf.mxu0  ;;  %v454_v10 = vpop.f32.mrf.mxu1 }
  0xbb   : > { %v435_v17 = vadd.f32 %v1066_v24, %v434_v9  ;;  %v455_v18 = vadd.f32 %v1066_v24, %v454_v10 }
  0xbc   : > { %v523_v13 = vmax.f32 %v472_v7, 0.0  ;;  %v531_v14 = vmax.f32 %v492_v8, 0.0 }
  0xbd   : > { %v508_v26 = vmax.f32 %v435_v17, 0.0  ;;  %v516_v27 = vmax.f32 %v455_v18, 0.0 }
  0xbe   : > { %v869_v15 = vpack.c.bf16 %v523_v13, %v522_v11  ;;  %v889_v16 = vpack.c.bf16 %v531_v14, %v530_v12 }
  0xc0   : > { %909 = vst [vmem:[%s1077_s4 + $0x48] sm:$0xff] %v869_v15  }
  0xc1   : > { %913 = vst [vmem:[%s1077_s4 + $0x68] sm:$0xff] %v889_v16   ;;  %v474_v19 = vpop.f32.mrf.mxu2  ;;  %v494_v20 = vpop.f32.mrf.mxu3 }
  0xc2   : > { %v436_v21 = vpop.f32.mrf.mxu0  ;;  %v456_v22 = vpop.f32.mrf.mxu1  ;;  %v475_v32 = vadd.f32 %v1066_v24, %v474_v19  ;;  %v495_v33 = vadd.f32 %v1066_v24, %v494_v20 }
  0xc3   : > { %v437_v23 = vadd.f32 %v1066_v24, %v436_v21  ;;  %v457_v25 = vadd.f32 %v1066_v24, %v456_v22 }
  0xc4   : > { %v524_v40 = vmax.f32 %v475_v32, 0.0  ;;  %v532_v41 = vmax.f32 %v495_v33, 0.0 }
  0xc5   : > { %v509_v28 = vmax.f32 %v437_v23, 0.0  ;;  %v517_v29 = vmax.f32 %v457_v25, 0.0 }
  0xc7   : > { %v834_v30 = vpack.c.bf16 %v509_v28, %v508_v26  ;;  %v854_v31 = vpack.c.bf16 %v517_v29, %v516_v27 }
  0xc9   : > { %902 = vst [vmem:[%s1077_s4 + $0x10] sm:$0xff] %v834_v30   ;;  %v476_v34 = vpop.f32.mrf.mxu2  ;;  %v496_v35 = vpop.f32.mrf.mxu3 }
  0xca   : > { %906 = vst [vmem:[%s1077_s4 + $0x30] sm:$0xff] %v854_v31   ;;  %v477_v36 = vadd.f32 %v1066_v24, %v476_v34  ;;  %v497_v37 = vadd.f32 %v1066_v24, %v496_v35  ;;  %v439_v38 = vpop.f32.mrf.mxu0  ;;  %v459_v39 = vpop.f32.mrf.mxu1 }
  0xcb   : > { %v440_v46 = vadd.f32 %v1066_v24, %v439_v38  ;;  %v460_v47 = vadd.f32 %v1066_v24, %v459_v39 }
  0xcc   : > { %v525_v42 = vmax.f32 %v477_v36, 0.0  ;;  %v533_v43 = vmax.f32 %v497_v37, 0.0 }
  0xcd   : > { %v510_v54 = vmax.f32 %v440_v46, 0.0  ;;  %v518_v55 = vmax.f32 %v460_v47, 0.0 }
  0xce   : > { %v874_v44 = vpack.c.bf16 %v525_v42, %v524_v40  ;;  %v894_v45 = vpack.c.bf16 %v533_v43, %v532_v41 }
  0xd0   : > { %910 = vst [vmem:[%s1077_s4 + $0x50] sm:$0xff] %v874_v44  }
  0xd1   : > { %914 = vst [vmem:[%s1077_s4 + $0x70] sm:$0xff] %v894_v45   ;;  %v479_v48 = vpop.f32.mrf.mxu2  ;;  %v499_v49 = vpop.f32.mrf.mxu3 }
  0xd2   : > { %v441_v50 = vpop.f32.mrf.mxu0  ;;  %v461_v51 = vpop.f32.mrf.mxu1  ;;  %v480_v60 = vadd.f32 %v1066_v24, %v479_v48  ;;  %v500_v61 = vadd.f32 %v1066_v24, %v499_v49 }
  0xd3   : > { %v442_v52 = vadd.f32 %v1066_v24, %v441_v50  ;;  %v462_v53 = vadd.f32 %v1066_v24, %v461_v51 }
  0xd4   : > { %v526_v2 = vmax.f32 %v480_v60, 0.0  ;;  %v534_v3 = vmax.f32 %v500_v61, 0.0 }
  0xd5   : > { %v511_v56 = vmax.f32 %v442_v52, 0.0  ;;  %v519_v57 = vmax.f32 %v462_v53, 0.0 }
  0xd7   : > { %v839_v58 = vpack.c.bf16 %v511_v56, %v510_v54  ;;  %v859_v59 = vpack.c.bf16 %v519_v57, %v518_v55 }
  0xd9   : > { %903 = vst [vmem:[%s1077_s4 + $0x18] sm:$0xff] %v839_v58   ;;  %v481_v62 = vpop.f32.mrf.mxu2  ;;  %v501_v63 = vpop.f32.mrf.mxu3 }
  0xda   : > { %907 = vst [vmem:[%s1077_s4 + $0x38] sm:$0xff] %v859_v59   ;;  %v482_v0 = vadd.f32 %v1066_v24, %v481_v62  ;;  %v502_v1 = vadd.f32 %v1066_v24, %v501_v63 }
  0xdc   : > { %v527_v4 = vmax.f32 %v482_v0, 0.0  ;;  %v535_v5 = vmax.f32 %v502_v1, 0.0 }
  0xde   : > { %v879_v6 = vpack.c.bf16 %v527_v4, %v526_v2  ;;  %v899_v7 = vpack.c.bf16 %v535_v5, %v534_v3 }
  0xe0   : > { %911 = vst [vmem:[%s1077_s4 + $0x58] sm:$0xff] %v879_v6  }
  0xe1   : > { %915 = vst [vmem:[%s1077_s4 + $0x78] sm:$0xff] %v899_v7  }
  0xe2 PF: > { %s13_s14 = sadd.s32 1, %s972_s14   ;;  %s1136_s12 = smov %s968_s13 }
  0xe3   : > { %p10_p5 = scmp.ge.s32.totalorder %s13_s14, 4   ;;  %s1137_s13 = smov %s1139_s15 }
  0xe5   :  { %12 = sbr.rel (!%p10_p5) target bundleno = 2 (0x2), region = 68 }

</bundles_post_ra>
